<compile_context>
chip_gen: v5e
topology: v5e:2x2
jax: 0.10.0
libtpu: 0.0.40
codegen_flags: <defaults>
</compile_context>

<pallas_src>
import jax
import jax.numpy as jnp
from jax.experimental import pallas as pl
from jax.experimental.pallas import tpu as pltpu

RATE_MIN = 1e-12
RATE_MAX = 1e12
SOFTPLUS_THRESHOLD = 20.0  # torch.nn.functional.softplus default threshold


def _torch_softplus(x):
    # softplus with torch's threshold=20 behaviour (exact for x <= 20, identity above)
    return jnp.where(x > SOFTPLUS_THRESHOLD, x,
                     jnp.log1p(jnp.exp(jnp.minimum(x, SOFTPLUS_THRESHOLD))))


def _round_up(x, m):
    return ((x + m - 1) // m) * m


def pois_decoder_kernel(b_ref, l_ref, u_ref, vt_ref, params_ref, rate_ref):
    tn = u_ref.shape[0]
    nb = params_ref.shape[0]
    f = rate_ref.shape[-1]

    # MXU: u_tile @ v^T (v pre-transposed in the wrapper -> no in-kernel XLU transpose).
    uv = jnp.dot(u_ref[...], vt_ref[...],
                 preferred_element_type=jnp.float32)                  # (TN, F)

    # Fused row-gather of [softplus(scale_lin) | bias] by batch index: one
    # one-hot MXU matmul (softplus already applied once in the wrapper).
    batch_iota = jax.lax.broadcasted_iota(jnp.int32, (tn, nb), 1)
    onehot_b = (b_ref[...] == batch_iota).astype(jnp.float32)         # (TN, NB)
    gathered = jnp.dot(onehot_b, params_ref[...],
                       preferred_element_type=jnp.float32)            # (TN, 2F)
    scale = gathered[:, :f]                                           # already softplus'd
    bias = gathered[:, f:]

    z = scale * uv + bias                                             # (TN, F)

    # Numerically stable row softmax; library-size scaling fused into the
    # normalization so only one (TN,1) reciprocal + one (TN,F) multiply remain.
    z = z - jnp.max(z, axis=-1, keepdims=True)
    ez = jnp.exp(z)
    denom = jnp.sum(ez, axis=-1, keepdims=True)                       # (TN, 1)
    inv = l_ref[...] * pl.reciprocal(denom, approx=False)             # exact, keeps row-sum check
    rate_ref[...] = jnp.clip(ez * inv, RATE_MIN, RATE_MAX)


def pois_data_decoder_forward(u, v, b, l, scale_lin, bias, *,
                              tile_n=512, matmul_dtype=jnp.float32):
    """Returns the clamped Poisson rate (the parameter of D.Poisson(rate=...))."""
    N, D = u.shape
    F_ = v.shape[0]
    NB = scale_lin.shape[0]

    # ---- parameter prep: tiny (NB, F) / (F, D) ops done once in the wrapper ----
    F_pad = _round_up(F_, 128)                       # lane-dense stores
    scale = _torch_softplus(scale_lin.astype(jnp.float32))   # hoisted softplus
    bias_f = bias.astype(jnp.float32)
    vt = v.astype(matmul_dtype).T                    # (D, F), pre-transposed
    if F_pad != F_:
        pad = F_pad - F_
        vt = jnp.pad(vt, ((0, 0), (0, pad)))
        scale = jnp.pad(scale, ((0, 0), (0, pad)))
        # very negative bias -> exp ~ 0 -> padded lanes don't disturb the softmax
        bias_f = jnp.pad(bias_f, ((0, 0), (0, pad)), constant_values=-1e30)
    params = jnp.concatenate([scale, bias_f], axis=1)          # (NB, 2*F_pad)

    u_in = u.astype(matmul_dtype)
    b_in = b.reshape(N, 1).astype(jnp.int32)
    l_in = l.reshape(N, 1).astype(jnp.float32)

    # ---- tile-size / VMEM budgeting (v7x-safe: stay well under 64 MiB) ----
    resident_bytes = 4 * (D * F_pad + NB * 2 * F_pad)          # vt + params (resident)
    in_bpe = jnp.dtype(matmul_dtype).itemsize
    # double-buffered per-step IO + ~8 f32 (TN, F) temporaries (uv, gathered, z, ez, ...)
    bytes_per_row = 2 * (in_bpe * D + 4 * 2 + 4 * F_pad) + 8 * 4 * F_pad

    tn = _round_up(max(8, min(tile_n, pl.cdiv(N, 2))), 8)      # >= 2 grid steps (megacore)
    vmem_cap_rows = max(8, ((48 << 20) - resident_bytes) // max(bytes_per_row, 1))
    tn = min(tn, max(8, (vmem_cap_rows // 8) * 8))

    vmem_limit = resident_bytes + tn * bytes_per_row + (8 << 20)
    vmem_limit = int(min(max(vmem_limit, 32 << 20), 64 << 20))

    grid = (pl.cdiv(N, tn),)                                   # partial tail block is masked
    rate = pl.pallas_call(
        pois_decoder_kernel,
        out_shape=jax.ShapeDtypeStruct((N, F_pad), jnp.float32),
        grid_spec=pltpu.PrefetchScalarGridSpec(
            num_scalar_prefetch=0,
            grid=grid,
            in_specs=[
                pl.BlockSpec((tn, 1), lambda i: (i, 0)),          # batch ids
                pl.BlockSpec((tn, 1), lambda i: (i, 0)),          # library sizes
                pl.BlockSpec((tn, D), lambda i: (i, 0)),          # u tile
                pl.BlockSpec((D, F_pad), lambda i: (0, 0)),       # v^T (resident)
                pl.BlockSpec((NB, 2 * F_pad), lambda i: (0, 0)),  # [softplus(scale)|bias]
            ],
            out_specs=pl.BlockSpec((tn, F_pad), lambda i: (i, 0)),
        ),
        compiler_params=pltpu.CompilerParams(
            dimension_semantics=("parallel",),
            vmem_limit_bytes=vmem_limit),
    )(b_in, l_in, u_in, vt, params)
    return rate[:, :F_] if F_pad != F_ else rate


def reference_forward(u, v, b, l, scale_lin, bias):
    """Plain-JAX reference mirroring the PyTorch module."""
    scale = _torch_softplus(scale_lin[b])
    rate = scale * (u @ v.T) + bias[b]
    rate = jax.nn.softmax(rate, axis=1) * l.reshape(-1, 1)
    return jnp.clip(rate, RATE_MIN, RATE_MAX)


if __name__ == "__main__":
    N, D, F_, NB = 30, 32, 128, 3   # data points, embed dim, n_features, n_batches

    key = jax.random.PRNGKey(0)
    k = jax.random.split(key, 6)

    u = jax.random.normal(k[0], (N, D), jnp.float32)                   # data embedding
    v = jax.random.normal(k[1], (F_, D), jnp.float32)                  # feature embedding
    b = jax.random.randint(k[2], (N,), 0, NB, jnp.int32)               # batch assignment
    l = jax.random.uniform(k[3], (N, 1), jnp.float32, 500.0, 2000.0)   # library size
    # NOTE: the torch module initializes scale_lin / bias to zeros; random values
    # are used here so the kernel computes something non-trivial.
    scale_lin = jax.random.normal(k[4], (NB, F_), jnp.float32) * 0.5
    bias = jax.random.normal(k[5], (NB, F_), jnp.float32) * 0.5

    rate = pois_data_decoder_forward(u, v, b, l, scale_lin, bias)
    jax.block_until_ready(rate)

    rate_ref = reference_forward(u, v, b, l, scale_lin, bias)
    assert rate.shape == (N, F_)
    assert jnp.allclose(rate, rate_ref, atol=1e-4, rtol=1e-4)
    assert bool(jnp.all(rate > 0.0))
    # softmax rows times library size must sum back to the library size
    assert jnp.allclose(jnp.sum(rate, axis=1), l.reshape(-1), rtol=1e-4)

    print("KERNEL_OK")
</pallas_src>

<mosaic_0001>
module attributes {stable_mosaic.version = 11 : i64} {
  func.func @pois_decoder_kernel(%arg0: i32, %arg1: memref<16x1xi32, #tpu.memory_space<vmem>>, %arg2: memref<16x1xf32, #tpu.memory_space<vmem>>, %arg3: memref<16x32xf32, #tpu.memory_space<vmem>>, %arg4: memref<32x128xf32, #tpu.memory_space<vmem>>, %arg5: memref<3x256xf32, #tpu.memory_space<vmem>>, %arg6: memref<16x128xf32, #tpu.memory_space<vmem>>) attributes {dimension_semantics = [#tpu.dimension_semantics<parallel>], iteration_bounds = array<i64: 2>, scalar_prefetch = 0 : i64, scratch_operands = 0 : i64, tpu.core_type = #tpu.core_type<tc>, window_params = [{transform_indices = @transform_0, window_bounds = array<i64: 16, 1>}, {transform_indices = @transform_1, window_bounds = array<i64: 16, 1>}, {transform_indices = @transform_2, window_bounds = array<i64: 16, 32>}, {pipeline_mode = #tpu.pipeline_mode<synchronous>, transform_indices = @transform_3, window_bounds = array<i64: 32, 128>}, {pipeline_mode = #tpu.pipeline_mode<synchronous>, transform_indices = @transform_4, window_bounds = array<i64: 3, 256>}, {transform_indices = @transform_5, window_bounds = array<i64: 16, 128>}]} {
    %c0 = arith.constant 0 : index
    %c0_0 = arith.constant 0 : index
    %0 = vector.load %arg3[%c0, %c0_0] : memref<16x32xf32, #tpu.memory_space<vmem>>, vector<16x32xf32>
    %c0_1 = arith.constant 0 : index
    %c0_2 = arith.constant 0 : index
    %1 = vector.load %arg4[%c0_1, %c0_2] : memref<32x128xf32, #tpu.memory_space<vmem>>, vector<32x128xf32>
    %cst = arith.constant dense<0.000000e+00> : vector<16x128xf32>
    %2 = tpu.matmul %0, %1, %cst {dimension_numbers = #tpu.dot_dimension_numbers<[1], [0], [0], [1], [0, 0, 1, 1], [], []>} : vector<16x32xf32>, vector<32x128xf32>, vector<16x128xf32> -> vector<16x128xf32>
    %3 = tpu.iota {dimensions = array<i32: 1>} : vector<16x3xi32>
    %c0_3 = arith.constant 0 : index
    %c0_4 = arith.constant 0 : index
    %4 = vector.load %arg1[%c0_3, %c0_4] : memref<16x1xi32, #tpu.memory_space<vmem>>, vector<16x1xi32>
    %5 = vector.broadcast %4 : vector<16x1xi32> to vector<16x3xi32>
    %6 = arith.cmpi eq, %5, %3 : vector<16x3xi32>
    %7 = arith.extui %6 : vector<16x3xi1> to vector<16x3xi32>
    %8 = arith.sitofp %7 : vector<16x3xi32> to vector<16x3xf32>
    %c0_5 = arith.constant 0 : index
    %c0_6 = arith.constant 0 : index
    %9 = vector.load %arg5[%c0_5, %c0_6] : memref<3x256xf32, #tpu.memory_space<vmem>>, vector<3x256xf32>
    %cst_7 = arith.constant dense<0.000000e+00> : vector<16x256xf32>
    %10 = tpu.matmul %8, %9, %cst_7 {dimension_numbers = #tpu.dot_dimension_numbers<[1], [0], [0], [1], [0, 0, 1, 1], [], []>} : vector<16x3xf32>, vector<3x256xf32>, vector<16x256xf32> -> vector<16x256xf32>
    %11 = vector.extract_strided_slice %10 {offsets = [0, 0], sizes = [16, 128], strides = [1, 1]} : vector<16x256xf32> to vector<16x128xf32>
    %12 = vector.extract_strided_slice %10 {offsets = [0, 128], sizes = [16, 128], strides = [1, 1]} : vector<16x256xf32> to vector<16x128xf32>
    %13 = arith.mulf %11, %2 : vector<16x128xf32>
    %14 = arith.addf %13, %12 : vector<16x128xf32>
    %cst_8 = arith.constant dense<0xFF800000> : vector<16xf32>
    %15 = vector.multi_reduction <maximumf>, %14, %cst_8 [1] : vector<16x128xf32> to vector<16xf32>
    %16 = vector.shape_cast %15 : vector<16xf32> to vector<16x1xf32>
    %17 = vector.broadcast %16 : vector<16x1xf32> to vector<16x128xf32>
    %18 = arith.subf %14, %17 : vector<16x128xf32>
    %19 = math.exp %18 : vector<16x128xf32>
    %cst_9 = arith.constant dense<0.000000e+00> : vector<16xf32>
    %20 = vector.multi_reduction <add>, %19, %cst_9 [1] : vector<16x128xf32> to vector<16xf32>
    %21 = vector.shape_cast %20 : vector<16xf32> to vector<16x1xf32>
    %c0_10 = arith.constant 0 : index
    %c0_11 = arith.constant 0 : index
    %22 = vector.load %arg2[%c0_10, %c0_11] : memref<16x1xf32, #tpu.memory_space<vmem>>, vector<16x1xf32>
    %23 = tpu.reciprocal %21 : vector<16x1xf32> -> vector<16x1xf32>
    %24 = arith.mulf %22, %23 : vector<16x1xf32>
    %25 = vector.broadcast %24 : vector<16x1xf32> to vector<16x128xf32>
    %26 = arith.mulf %19, %25 : vector<16x128xf32>
    %cst_12 = arith.constant 9.99999996E-13 : f32
    %cst_13 = arith.constant 9.99999995E+11 : f32
    %27 = vector.broadcast %cst_12 : f32 to vector<16x128xf32>
    %28 = arith.maximumf %27, %26 : vector<16x128xf32>
    %29 = vector.broadcast %cst_13 : f32 to vector<16x128xf32>
    %30 = arith.minimumf %29, %28 : vector<16x128xf32>
    %c0_14 = arith.constant 0 : index
    %c0_15 = arith.constant 0 : index
    %31 = vector.load %arg6[%c0_14, %c0_15] : memref<16x128xf32, #tpu.memory_space<vmem>>, vector<16x128xf32>
    tpu.vector_store %arg6[%c0_14, %c0_15], %30 {strides = array<i32>} : memref<16x128xf32, #tpu.memory_space<vmem>>, vector<16x128xf32>,
    return
  }
  func.func @transform_0(%arg0: i32) -> (i32, i32) {
    %c0_i32 = arith.constant 0 : i32
    %c0_i32_0 = arith.constant 0 : i32
    return %arg0, %c0_i32 : i32, i32
  }
  func.func @transform_1(%arg0: i32) -> (i32, i32) {
    %c0_i32 = arith.constant 0 : i32
    %c0_i32_0 = arith.constant 0 : i32
    return %arg0, %c0_i32 : i32, i32
  }
  func.func @transform_2(%arg0: i32) -> (i32, i32) {
    %c0_i32 = arith.constant 0 : i32
    %c0_i32_0 = arith.constant 0 : i32
    return %arg0, %c0_i32 : i32, i32
  }
  func.func @transform_3(%arg0: i32) -> (i32, i32) {
    %c0_i32 = arith.constant 0 : i32
    %c0_i32_0 = arith.constant 0 : i32
    %c0_i32_1 = arith.constant 0 : i32
    return %c0_i32, %c0_i32_0 : i32, i32
  }
  func.func @transform_4(%arg0: i32) -> (i32, i32) {
    %c0_i32 = arith.constant 0 : i32
    %c0_i32_0 = arith.constant 0 : i32
    %c0_i32_1 = arith.constant 0 : i32
    return %c0_i32, %c0_i32_0 : i32, i32
  }
  func.func @transform_5(%arg0: i32) -> (i32, i32) {
    %c0_i32 = arith.constant 0 : i32
    %c0_i32_0 = arith.constant 0 : i32
    return %arg0, %c0_i32 : i32, i32
  }
}

</mosaic_0001>

<bundles_post_ra>
// kernel: tpu_custom_call.1
= control target key start
LH: loop header
LB: loop body
LE: loop exit
PB: predicated region body
PF: predicated region fallthrough
CT: control target
= control target key end

     0   :  { %10 = vsyncpa [#allocation3], 0  ;;  %s923_s0 = inlined_call_operand.vmem [shape: s32[30,1], index: 0, kind: input, shape index: {}]   ;;  %s924_s1 = inlined_call_operand.vmem [shape: f32[30,1], index: 1, kind: input, shape index: {}]   ;;  %s925_s2 = inlined_call_operand.vmem [shape: f32[30,32], index: 2, kind: input, shape index: {}]   ;;  %s926_s3 = inlined_call_operand.vmem [shape: f32[32,128], index: 3, kind: input, shape index: {}]   ;;  %s927_s4 = inlined_call_operand.hbm [shape: f32[3,256], index: 4, kind: input, shape index: {}]   ;;  %s928_s5 = inlined_call_operand.hbm [shape: f32[30,128], index: 5, kind: output, shape index: {}]  }
   0x1   :  { %11 = vsyncpa [#allocation4], 0 }
   0x2   :  { %13 = vsyncpa [#allocation4 + $0x1], 0  ;;  %s812_s18 = smov 0   ;;  %s814_s19 = smov 0  }
   0x3   :  { %s816_s20 = smov 0   ;;  %s818_s21 = smov 0  }
   0x4 LB: > { %s833_s22 = sadd.s32 4294967295, %s775_s21   ;;  %s582_s23 = sadd.s32 4294967294, %s775_s21   ;;  %s775_s21 = sphi %s818_s21, %s934_s21   ;;  %s771_s20 = sphi %s816_s20, %s933_s20   ;;  %s767_s19 = sphi %s814_s19, %s932_s19   ;;  %s763_s18 = sphi %s812_s18, %s931_s18  }
   0x5   : > { %s837_s24 = sadd.s32 1, %s775_s21   ;;  %s146_s25 = sadd.s32 1, %s771_s20 }
   0x6   : > { %s143_s26 = ssub.s32 %s775_s21, %s837_s24  ;;  %p156_p0 = scmp.ne.s32.totalorder %s771_s20, %s767_s19 }
   0x7   : > { %p144_p1 = scmp.eq.s32.totalorder %s143_s26, 0  ;;  %p157_p2 = scmp.eq.s32.totalorder %s833_s22, 1 }
   0x8   : > { %p162_p3 = scmp.ne.s32.totalorder %s767_s19, %s763_s18  ;;  %p163_p4 = scmp.eq.s32.totalorder %s582_s23, 1 }
   0x9   : > { %s848_s27 = scalar_select %p144_p1, %s771_s20, %s146_s25  }
   0xa   : > { %p850_p5 = por %p157_p2, %p156_p0  ;;  %p854_p6 = por %p163_p4, %p162_p3 }
   0xb   : > { %p583_p7 = scmp.ge.s32.totalorder %s775_s21, 1  ;;  %p170_p8 = scmp.lt.s32.totalorder %s775_s21, 3 }
   0xc   : > { %p629_p9 = scmp.eq.s32.totalorder %s833_s22, 0  ;;  %s185_s7 = sshll.u32 %s927_s4, 4  ;;  %s186_s7 = int_to_ptr.hbm [resolvable:$true] %s185_s7 }
   0xd   : > { %p171_p10 = pnand %p583_p7, %p170_p8  ;;  %s777_s8 = smov [#allocation2]  }
   0xe   : > { %s187_s9 = sshll.u32 %s777_s8, 4  ;;  %s188_s9 = int_to_ptr.vmem [resolvable:$true] %s187_s9 }
   0xf   : > { %p621_p11 = pneg %p171_p10  ;;  %227 = sbr.rel (%p171_p10) target bundleno = 674 (0x2a2), region = 40 }
  0x11   : > { %p622_p12 = pnand %p629_p9, %p621_p11 }
  0x13   : > { %624 = dma.hbm_to_vmem [thread:$0]  (!%p622_p12), %s186_s7, 128, %s188_s9, [#allocation3]  }
  0x14   : > { %754 = dma.done.wait (%p629_p9), [#allocation3], 128  }
  0x15   : > { %756 = vsyncadd (%p629_p9), [#allocation3], 4294967168  ;;  %s589_s10 = sshll.u32 %s833_s22, 1  ;;  %v778_v0 = vmov 0   ;;  %v290_v2 = vld [vmem:[%s926_s3 + $0x18] sm:$0xff]  ;;  %v289_v3 = vld [vmem:[%s926_s3 + $0x10] sm:$0xff]  ;;  %v321_v12 = vlaneseq }
  0x16   : > { %669 = vset.pattern.permute.xlu0 %v778_v0  ;;  %p267_p13 = scmp.lt.s32.totalorder %s589_s10, 3  ;;  %670 = vset.pattern.permute.xlu1 %v778_v0  ;;  %v337_v5 = vld [vmem:[#allocation2] sm:$0x77]  ;;  %v287_v7 = vld [vmem:[%s926_s3] sm:$0xff]  ;;  %vm349_vm0 = vcmask 1042432   ;;  %vm291_vm1 = vcmask 261120  }
  0x17   : > { %310 = vmatpush.msra.mxu0 %v290_v2  ;;  %611 = vmatpush.msra.mxu3 %v290_v2  ;;  %339 = vst [vmem:[#allocation1] ss:$2 sm:$0xff] %v337_v5  ;;  %v288_v6 = vld [vmem:[%s926_s3 + $0x8] sm:$0xff]  ;;  %v322_v13 = vand.u32 127, %v321_v12  ;;  %vm342_vm2 = vcmask 23552   ;;  %v779_v15 = vmov 0.0  }
  0x18   : > { %s936_s10 = smov (!%p267_p13, %s589_s10), 3  ;;  %s610_s15 = sshll.u32 %s833_s22, 4 }
  0x19   : > { %s865_s11 = sshll.u32 %s936_s10, 3  ;;  %311 = vmatpush.msra.mxu0 %v289_v3  ;;  %612 = vmatpush.msra.mxu3 %v289_v3  ;;  %s480_s23 = scalar_lea.hbm %s928_s5, %s610_s15 }
  0x1a   : > { %s270_s14 = scalar_lea.vmem %s923_s0, %s865_s11  ;;  %s282_s7 = scalar_lea.vmem %s925_s2, %s865_s11 }
  0x1b   : > { %v323_v1 = vld [vmem:[%s270_s14] sm:$0xff]  ;;  %v324_v4 = vld [vmem:[%s270_s14 + $0x8] sm:$0xff]  ;;  %312 = vmatpush.msra.mxu0 %v288_v6  ;;  %613 = vmatpush.msra.mxu3 %v288_v6  ;;  %s276_s13 = scalar_lea.vmem %s924_s1, %s865_s11  ;;  %s263_s11 = sand.u32 1, %s767_s19  }
  0x1c   : > { %326 = vperm.xlu0 %669, %v323_v1   ;;  %v285_v10 = vld [vmem:[%s282_s7] sm:$0xff]  ;;  %v286_v11 = vld [vmem:[%s282_s7 + $0x8] sm:$0xff]  ;;  %s588_s14 = sshll.u32 %s263_s11, 4  ;;  %s483_s30 = sshll.u32 %s480_s23, 4  ;;  %s484_s30 = int_to_ptr.hbm [resolvable:$true] %s483_s30 }
  0x1d   : > { %313 = vmatpush.msra.mxu0 %v287_v7  ;;  %614 = vmatpush.msra.mxu3 %v287_v7  ;;  %v418_v48 = vld [vmem:[%s276_s13] sm:$0xff]  ;;  %v419_v59 = vld [vmem:[%s276_s13 + $0x8] sm:$0xff]  ;;  %s265_s25 = scalar_lea.vmem [#allocation5], %s588_s14  ;;  %s469_s6 = scalar_lea.sflag [#allocation4], %s263_s11 }
  0x1e   : > { %v340_v8 = vld.sshfl [vmem:[#allocation1] sm:$0xff pattern:$0x75316420]  ;;  %v341_v9 = vld.sshfl [vmem:[#allocation1 + $0x8] sm:$0xff pattern:$0x75316420]  ;;  %595 = vmatmul.msk.f32.vlgmr.msra.gmra.mxu0 %vm291_vm1, %v285_v10  ;;  %596 = vmatmul.msk.f32.vlgmr.msra.gmra.mxu3 %vm291_vm1, %v286_v11 }
  0x1f   : > { %599 = vmatpush.msk.msra.mxu1 %vm349_vm0, %v340_v8  ;;  %602 = vmatpush.msk.msra.mxu2 %vm349_vm0, %v341_v9  ;;  %s481_s26 = sshll.u32 %s265_s25, 4  ;;  %s723_s7 = sshra.s32 %s484_s30, 4  ;;  %s482_s26 = int_to_ptr.vmem [resolvable:$true] %s481_s26  ;;  %s724_s7 = int_to_ptr.hbm [resolvable:$true] %s723_s7 }
  0x20   : > { %s725_s22 = scalar_lea.hbm %s724_s7, 16  ;;  %s729_s10 = scalar_lea.hbm %s928_s5, 32 }
  0x21   : > { %p726_p0 = scmp.ne.s32.totalorder %s724_s7, %s725_s22  ;;  %p730_p3 = scmp.lt.s32.totalorder %s724_s7, %s928_s5 }
  0x22   : > { %p731_p4 = scmp.lt.s32.totalorder %s729_s10, %s725_s22 }
  0x23   : > { %p727_p1 = pnand %p726_p0, %p850_p5 }
  0x24   : > { %329 = vperm.xlu0 %669, %v324_v4   ;;  %p732_p7 = por %p731_p4, %p730_p3 }
  0x25   : > { %p728_p2 = pneg %p727_p1 }
  0x27   : > { %p733_p8 = pnand %p732_p7, %p728_p2 }
  0x8e   : > { %v327_v14 = vpop.permute.xlu0 %326 }
  0x8f   : > { %vm331_vm3 = vcmp.eq.s32.totalorder %v327_v14, %v322_v13 }
  0x90   : > { %v597_v16 = vsel %vm331_vm3, 1.0, %v779_v15 }
  0x91   : > { %600 = vmatmul.msk.f32.vlgmr.msra.gmra.mxu1 %vm342_vm2, %v597_v16  ;;  %603 = vmatmul.msk.f32.vlgmr.msra.gmra.mxu2 %vm342_vm2, %v597_v16 }
  0x96   : > { %v330_v17 = vpop.permute.xlu0 %329 }
  0x97   : > { %vm332_vm4 = vcmp.eq.s32.totalorder %v330_v17, %v322_v13 }
  0x98   : > { %v598_v18 = vsel %vm332_vm4, 1.0, %v779_v15 }
  0x99   : > { %601 = vmatmul.msk.f32.gmra.mxu1 %vm342_vm2, %v598_v18  ;;  %604 = vmatmul.msk.f32.gmra.mxu2 %vm342_vm2, %v598_v18 }
  0x9b   : > { %v315_v20 = vpop.f32.mrf.mxu0 }
  0xa1   : > { %v318_v24 = vpop.f32.mrf.mxu3 }
 0x10e   : > { %v371_v19 = vpop.f32.mrf.mxu1 }
 0x10f   : > { %v400_v21 = vmul.f32 %v371_v19, %v315_v20 }
 0x114   : > { %v394_v22 = vpop.f32.mrf.mxu2 }
 0x115   : > { %v402_v23 = vadd.f32 %v400_v21, %v394_v22 }
 0x116   : > { %v374_v25 = vpop.f32.mrf.mxu1 }
 0x117   : > { %404 = vmax.xlane.f32.xlu1 %v402_v23  ;;  %v401_v26 = vmul.f32 %v374_v25, %v318_v24 }
 0x11c   : > { %v397_v27 = vpop.f32.mrf.mxu2 }
 0x11d   : > { %v403_v28 = vadd.f32 %v401_v26, %v397_v27 }
 0x11f   : > { %406 = vmax.xlane.f32.xlu1 %v403_v28 }
 0x18a   : > { %v405_v29 = vpop.xlane.xlu1 %404 }
 0x18b   : > { %v408_v30 = vsub.f32 %v402_v23, %v405_v29 }
 0x18d   : > { %v410_v31 = vmul.f32 1.442695, %v408_v30 }
 0x18f   : > { %671 = vpow2.f32 %v410_v31 }
 0x192   : > { %v407_v32 = vpop.xlane.xlu1 %406 }
 0x193   : > { %v409_v33 = vsub.f32 %v403_v28, %v407_v32 }
 0x195   : > { %v672_v34 = vpop.eup %671  ;;  %v412_v35 = vmul.f32 1.442695, %v409_v33 }
 0x196   : > { %414 = vadd.xlane.f32.xlu2 %v672_v34 }
 0x197   : > { %673 = vpow2.f32 %v412_v35 }
 0x19d   : > { %v674_v36 = vpop.eup %673 }
 0x19e   : > { %416 = vadd.xlane.f32.xlu2 %v674_v36 }
 0x209   : > { %v415_v37 = vpop.xlane.xlu2 %414 }
 0x20a   : > { %675 = vrcp.f32 %v415_v37  ;;  %v431_v42 = vand.u32 2147483648, %v415_v37  ;;  %v429_v44 = vand.u32 2147483647, %v415_v37  ;;  %vm425_vm6 = vweird.f32 %v415_v37 }
 0x20c   : > { %v432_v47 = vor.u32 1.1754944e-38, %v431_v42  ;;  %vm430_vm8 = vcmp.eq.f32.partialorder %v429_v44, 8.507059e+37 }
 0x210   : > { %v676_v38 = vpop.eup %675 }
 0x211   : > { %v421_v39 = vmul.f32 %v676_v38, %v415_v37  ;;  %v417_v40 = vpop.xlane.xlu2 %416  ;;  %vm426_vm5 = vweird.f32 %v676_v38 }
 0x212   : > { %677 = vrcp.f32 %v417_v40  ;;  %vm427_vm7 = vmor %vm425_vm6, %vm426_vm5  ;;  %v445_v54 = vand.u32 2147483648, %v417_v40  ;;  %v443_v56 = vand.u32 2147483647, %v417_v40  ;;  %vm439_vm10 = vweird.f32 %v417_v40 }
 0x213   : > { %v422_v41 = vsub.f32 1.0, %v421_v39 }
 0x214   : > { %v446_v58 = vor.u32 1.1754944e-38, %v445_v54  ;;  %vm444_vm12 = vcmp.eq.f32.partialorder %v443_v56, 8.507059e+37 }
 0x215   : > { %v423_v43 = vmul.f32 %v676_v38, %v422_v41 }
 0x217   : > { %v424_v45 = vadd.f32 %v676_v38, %v423_v43 }
 0x218   : > { %v678_v46 = vpop.eup %677 }
 0x219   : > { %v435_v49 = vmul.f32 %v678_v46, %v417_v40  ;;  %v428_v50 = vsel %vm427_vm7, %v676_v38, %v424_v45  ;;  %vm440_vm9 = vweird.f32 %v678_v46 }
 0x21a   : > { %v433_v51 = vsel %vm430_vm8, %v432_v47, %v428_v50  ;;  %vm441_vm11 = vmor %vm439_vm10, %vm440_vm9 }
 0x21b   : > { %v436_v52 = vsub.f32 1.0, %v435_v49  ;;  %v448_v53 = vmul.f32 %v433_v51, %v418_v48 }
 0x21d   : > { %v437_v55 = vmul.f32 %v678_v46, %v436_v52  ;;  %452 = vperm.xlu0 %669, %v448_v53  }
 0x21f   : > { %v438_v57 = vadd.f32 %v678_v46, %v437_v55 }
 0x221   : > { %v442_v60 = vsel %vm441_vm11, %v678_v46, %v438_v57 }
 0x222   : > { %v447_v61 = vsel %vm444_vm12, %v446_v58, %v442_v60 }
 0x223   : > { %v449_v62 = vmul.f32 %v447_v61, %v419_v59 }
 0x225   : > { %457 = vperm.xlu1 %670, %v449_v62  }
 0x28f   : > { %v453_v63 = vpop.permute.xlu0 %452 }
 0x290   : > { %v460_v0 = vmul.f32 %v672_v34, %v453_v63 }
 0x292   : > { %v462_v1 = vmax.f32 %v460_v0, 1e-12 }
 0x294   : > { %v464_v2 = vmin.f32 %v462_v1, 1e+12 }
 0x296   : > { %466 = vst [vmem:[%s265_s25] sm:$0xff] %v464_v2 }
 0x297   : > { %v458_v3 = vpop.permute.xlu1 %457 }
 0x298   : > { %v461_v4 = vmul.f32 %v674_v36, %v458_v3 }
 0x29a   : > { %v463_v5 = vmax.f32 %v461_v4, 1e-12 }
 0x29c   : > { %v465_v6 = vmin.f32 %v463_v5, 1e+12 }
 0x29e   : > { %467 = vst [vmem:[%s265_s25 + $0x8] sm:$0xff] %v465_v6 }
 0x29f   : > { %736 = shalt.err (!%p733_p8)
}
 0x2a0   : > { %s780_s11 = smov 128   ;;  %s781_s14 = smov 8  }
 0x2a1   : > { %619 = dma.vmem_to_hbm [thread:$0]  (%p850_p5), %s482_s26, 256, %s484_s30, %s469_s6, %s780_s11, %s780_s11, %s781_s14  }
 0x2a2 PF: > { %p631_p9 = scmp.ge.s32.totalorder %s775_s21, 2  ;;  %s498_s15 = sand.u32 1, %s763_s18  }
 0x2a3   : > { %s499_s16 = scalar_lea.sflag [#allocation4], %s498_s15 }
 0x2a4   : > { %p626_p10 = pnand %p631_p9, %p854_p6 }
 0x2a6   : > { %p627_p11 = pneg %p626_p10 }
 0x2a8   : > { %758 = dma.done.wait (%p627_p11), %s499_s16, 256  }
 0x2a9   : > { %760 = vsyncadd (%p627_p11), %s499_s16, 4294967040  ;;  %p16_p12 = scmp.ge.s32.totalorder %s837_s24, 4   ;;  %s931_s18 = smov %s767_s19 }
 0x2aa   : > { %s932_s19 = smov %s771_s20  ;;  %s933_s20 = smov %s848_s27 }
 0x2ab   : > { %s934_s21 = smov %s837_s24  ;;  %18 = sbr.rel (!%p16_p12) target bundleno = 4 (0x4), region = 86 }
 0x2b0   :  { %505 = vsyncpa [#allocation3], 1 }
 0x2b1   :  { %507 = vsyncpa [#allocation3 + $0x1], 1 }
 0x2b2   :  { %508 = vsyncpa [#allocation4], 1 }
 0x2b3   :  { %510 = vsyncpa [#allocation4 + $0x1], 1 }

</bundles_post_ra>
